<compile_context>
chip_gen: v7x
topology: tpu7x:2x2x1
jax: 0.10.0
libtpu: 0.0.40
codegen_flags: <defaults>
</compile_context>

<pallas_src>
import jax
import jax.numpy as jnp
from jax.experimental import pallas as pl
from jax.experimental.pallas import tpu as pltpu

_EPS = 1e-5
_SUBLANE = 8
_MAX_ROW_TILE = 512
_MATMUL_DTYPE = jnp.bfloat16          # MXU operand dtype (jnp.float32 for exact match)
_VMEM_LIMIT = 32 * 1024 * 1024


def _round_up(x, m):
    return (x + m - 1) // m * m


def _cdiv(a, b):
    return (a + b - 1) // b


# ---------------------------------------------------------------------------
# In-kernel math
# ---------------------------------------------------------------------------

def _layernorm(y, gamma, beta):
    mu = jnp.mean(y, axis=-1, keepdims=True)
    diff = y - mu
    var = jnp.mean(diff * diff, axis=-1, keepdims=True)
    return diff * jax.lax.rsqrt(var + _EPS) * gamma + beta


def _mlp_ln(x, w1, b1, w2, b2, gamma, beta):
    """LayerNorm(Linear2(SiLU(Linear1(x)))); matmul operands in w*.dtype, f32 acc."""
    h = jnp.dot(x.astype(w1.dtype), w1, preferred_element_type=jnp.float32) + b1
    h = h * jax.nn.sigmoid(h)                                     # SiLU (f32, EUP)
    y = jnp.dot(h.astype(w2.dtype), w2, preferred_element_type=jnp.float32) + b2
    return _layernorm(y, gamma, beta)


# ---------------------------------------------------------------------------
# Kernels
# ---------------------------------------------------------------------------

def _edge_kernel(x_ref, w1_ref, b1_ref, w2_ref, b2_ref, g_ref, bt_ref, o_ref):
    o_ref[...] = _mlp_ln(x_ref[...], w1_ref[...], b1_ref[...],
                         w2_ref[...], b2_ref[...], g_ref[...], bt_ref[...])


def _node_time_kernel(x_ref, t_ref,
                      nw1_ref, nb1_ref, nw2_ref, nb2_ref, ng_ref, nbt_ref,
                      rw_ref, tw1c_ref, tw1s_ref, tb1_ref, tw2_ref, tb2_ref,
                      tg_ref, tbt_ref, o_ref):
    # ---- node branch: LN(MLP(x)) --------------------------------------------
    h_node = _mlp_ln(x_ref[...], nw1_ref[...], nb1_ref[...],
                     nw2_ref[...], nb2_ref[...], ng_ref[...], nbt_ref[...])
    # ---- time branch (fused): RFF + MLP + LN ---------------------------------
    # t: [bm, 1], rff_w: [1, half] -> K=1 outer product = broadcast multiply.
    proj = (2.0 * jnp.pi) * (t_ref[...] * rw_ref[...])            # [bm, half] f32
    cosp = jnp.cos(proj)
    sinp = jnp.sin(proj)
    tw1c = tw1c_ref[...]
    tw1s = tw1s_ref[...]
    tw2 = tw2_ref[...]
    # concat([cos, sin]) @ W1 == cos @ W1[:half] + sin @ W1[half:]   (no lane concat)
    h = (jnp.dot(cosp.astype(tw1c.dtype), tw1c, preferred_element_type=jnp.float32)
         + jnp.dot(sinp.astype(tw1s.dtype), tw1s, preferred_element_type=jnp.float32)
         + tb1_ref[...])
    h = h * jax.nn.sigmoid(h)
    y = jnp.dot(h.astype(tw2.dtype), tw2, preferred_element_type=jnp.float32) + tb2_ref[...]
    h_time = _layernorm(y, tg_ref[...], tbt_ref[...])
    # ---- fused add ------------------------------------------------------------
    o_ref[...] = h_node + h_time


# ---------------------------------------------------------------------------
# Tiling / spec helpers
# ---------------------------------------------------------------------------

def _pick_tiling(n):
    """Return (row_tile, padded_rows).

    * n <= 8:  single tile of round_up(n, 8) rows.
    * else:    >= 2 grid steps (v7x megacore), tiles <= ~512 rows, and row
               padding bounded by < 8 rows per tile (not up to bm-1 rows).
    """
    n8 = _round_up(n, _SUBLANE)
    if n8 <= _SUBLANE:
        return n8, n8
    tiles = max(2, _cdiv(n8, _MAX_ROW_TILE))
    bm = _round_up(_cdiv(n, tiles), _SUBLANE)
    n_p = _cdiv(n, bm) * bm
    return bm, n_p


def _pspec(shape):
    # Grid-invariant parameter block (whole array, constant index map).
    return pl.BlockSpec(shape, lambda i: (0, 0))


# ---------------------------------------------------------------------------
# Wrappers
# ---------------------------------------------------------------------------

def mlp_layernorm(x, w1, b1, w2, b2, gamma, beta):
    """Fused LayerNorm(Linear2(SiLU(Linear1(x)))); used for the edge branch.

    Expects weights in _MATMUL_DTYPE and bias/LN params as (1, d) f32 rows
    (see prepare_params)."""
    n, d_in = x.shape
    d_h = w1.shape[1]
    d_out = w2.shape[1]
    bm, n_p = _pick_tiling(n)
    x_p = x if n_p == n else jnp.pad(x, ((0, n_p - n), (0, 0)))

    flops = 2 * n_p * (d_in * d_h + d_h * d_out)
    transc = n_p * (d_h + 1)
    bytes_accessed = (4 * n_p * (d_in + d_out)
                      + 2 * (d_in * d_h + d_h * d_out)
                      + 4 * (d_h + 3 * d_out))

    out = pl.pallas_call(
        _edge_kernel,
        out_shape=jax.ShapeDtypeStruct((n_p, d_out), jnp.float32),
        grid=(n_p // bm,),
        in_specs=[
            pl.BlockSpec((bm, d_in), lambda i: (i, 0)),
            _pspec((d_in, d_h)),
            _pspec((1, d_h)),
            _pspec((d_h, d_out)),
            _pspec((1, d_out)),
            _pspec((1, d_out)),
            _pspec((1, d_out)),
        ],
        out_specs=pl.BlockSpec((bm, d_out), lambda i: (i, 0)),
        compiler_params=pltpu.CompilerParams(
            dimension_semantics=("parallel",),
            vmem_limit_bytes=_VMEM_LIMIT),
        cost_estimate=pl.CostEstimate(
            flops=flops, transcendentals=transc, bytes_accessed=bytes_accessed),
    )(x_p, w1, b1, w2, b2, gamma, beta)
    return out if n_p == n else out[:n]


def node_time_embed(x, t, q):
    """Fused node branch: LN(MLP(x)) + LN(MLP(RFF(t))) in a single pallas_call."""
    n, d_in = x.shape
    d = q["node_w2"].shape[1]            # node_dim
    half = q["rff_w"].shape[1]
    bm, n_p = _pick_tiling(n)
    x_p = x if n_p == n else jnp.pad(x, ((0, n_p - n), (0, 0)))
    t_p = t if n_p == n else jnp.pad(t, ((0, n_p - n), (0, 0)))

    flops = 2 * n_p * (d_in * d + 3 * d * d)      # node MLP + time MLP
    transc = n_p * (3 * d + 2)                    # sigmoids + cos/sin + rsqrt
    bytes_accessed = (4 * n_p * (d_in + 1 + d)
                      + 2 * (d_in * d + 3 * d * d)
                      + 4 * (8 * d + half))

    out = pl.pallas_call(
        _node_time_kernel,
        out_shape=jax.ShapeDtypeStruct((n_p, d), jnp.float32),
        grid=(n_p // bm,),
        in_specs=[
            pl.BlockSpec((bm, d_in), lambda i: (i, 0)),   # x
            pl.BlockSpec((bm, 1), lambda i: (i, 0)),      # t
            _pspec((d_in, d)),                            # node_w1
            _pspec((1, d)),                               # node_b1
            _pspec((d, d)),                               # node_w2
            _pspec((1, d)),                               # node_b2
            _pspec((1, d)),                               # node_g
            _pspec((1, d)),                               # node_bt
            _pspec((1, half)),                            # rff_w
            _pspec((half, d)),                            # time_w1 (cos rows)
            _pspec((half, d)),                            # time_w1 (sin rows)
            _pspec((1, d)),                               # time_b1
            _pspec((d, d)),                               # time_w2
            _pspec((1, d)),                               # time_b2
            _pspec((1, d)),                               # time_g
            _pspec((1, d)),                               # time_bt
        ],
        out_specs=pl.BlockSpec((bm, d), lambda i: (i, 0)),
        compiler_params=pltpu.CompilerParams(
            dimension_semantics=("parallel",),
            vmem_limit_bytes=_VMEM_LIMIT),
        cost_estimate=pl.CostEstimate(
            flops=flops, transcendentals=transc, bytes_accessed=bytes_accessed),
    )(x_p, t_p,
      q["node_w1"], q["node_b1"], q["node_w2"], q["node_b2"],
      q["node_g"], q["node_bt"],
      q["rff_w"], q["time_w1c"], q["time_w1s"], q["time_b1"],
      q["time_w2"], q["time_b2"], q["time_g"], q["time_bt"])
    return out if n_p == n else out[:n]


# ---------------------------------------------------------------------------
# One-time parameter preparation (hoisted out of the forward path)
# ---------------------------------------------------------------------------

def prepare_params(p):
    """Cast matmul weights to _MATMUL_DTYPE, reshape bias/LN vectors to (1, d),
    and pre-split time_w1 into its cos/sin halves. Run once; reuse every step."""
    node_dim = p["node_w2"].shape[1]
    assert node_dim % 2 == 0, "node_dim must be even for the cos/sin RFF split"
    half = node_dim // 2
    wd = _MATMUL_DTYPE
    row = lambda v: v.reshape(1, -1).astype(jnp.float32)
    return {
        "node_w1": p["node_w1"].astype(wd), "node_b1": row(p["node_b1"]),
        "node_w2": p["node_w2"].astype(wd), "node_b2": row(p["node_b2"]),
        "node_g": row(p["node_g"]), "node_bt": row(p["node_bt"]),
        "edge_w1": p["edge_w1"].astype(wd), "edge_b1": row(p["edge_b1"]),
        "edge_w2": p["edge_w2"].astype(wd), "edge_b2": row(p["edge_b2"]),
        "edge_g": row(p["edge_g"]), "edge_bt": row(p["edge_bt"]),
        "rff_w": p["rff_w"].astype(jnp.float32),            # (1, half), stays f32
        "time_w1c": p["time_w1"][:half].astype(wd),
        "time_w1s": p["time_w1"][half:].astype(wd),
        "time_b1": row(p["time_b1"]),
        "time_w2": p["time_w2"].astype(wd), "time_b2": row(p["time_b2"]),
        "time_g": row(p["time_g"]), "time_bt": row(p["time_bt"]),
    }


# ---------------------------------------------------------------------------
# Parameters / reference / driver
# ---------------------------------------------------------------------------

def make_params(key, init_node_dim, init_edge_dim, node_dim, edge_dim):
    ks = jax.random.split(key, 16)

    def lin(k, din, dout):
        kw, kb = jax.random.split(k)
        return (0.1 * jax.random.normal(kw, (din, dout), jnp.float32),
                0.1 * jax.random.normal(kb, (dout,), jnp.float32))

    def ln(k, d):
        kg, kb = jax.random.split(k)
        return (1.0 + 0.1 * jax.random.normal(kg, (d,), jnp.float32),
                0.1 * jax.random.normal(kb, (d,), jnp.float32))

    p = {}
    p["node_w1"], p["node_b1"] = lin(ks[0], init_node_dim, node_dim)
    p["node_w2"], p["node_b2"] = lin(ks[1], node_dim, node_dim)
    p["node_g"], p["node_bt"] = ln(ks[2], node_dim)
    p["edge_w1"], p["edge_b1"] = lin(ks[3], init_edge_dim, edge_dim)
    p["edge_w2"], p["edge_b2"] = lin(ks[4], edge_dim, edge_dim)
    p["edge_g"], p["edge_bt"] = ln(ks[5], edge_dim)
    p["rff_w"] = jax.random.normal(ks[6], (1, node_dim // 2), jnp.float32)
    p["time_w1"], p["time_b1"] = lin(ks[7], node_dim, node_dim)
    p["time_w2"], p["time_b2"] = lin(ks[8], node_dim, node_dim)
    p["time_g"], p["time_bt"] = ln(ks[9], node_dim)
    return p


@jax.jit
def encoder_forward(x, edge_attr, t, q):
    # node branch: one fused kernel (MLP+LN for x, RFF+MLP+LN for t, and the add)
    h_node = node_time_embed(x, t, q)
    # edge branch: fused MLP+LN kernel
    h_edge = mlp_layernorm(edge_attr, q["edge_w1"], q["edge_b1"],
                           q["edge_w2"], q["edge_b2"],
                           q["edge_g"], q["edge_bt"])
    return h_node, h_edge


def reference_forward(x, edge_attr, t, p):
    def mlp_ln(z, w1, b1, w2, b2, g, bt):
        h = z @ w1 + b1
        h = h * jax.nn.sigmoid(h)
        y = h @ w2 + b2
        mu = y.mean(-1, keepdims=True)
        var = ((y - mu) ** 2).mean(-1, keepdims=True)
        return (y - mu) / jnp.sqrt(var + _EPS) * g + bt

    def rff(tt, w):
        proj = 2.0 * jnp.pi * (tt @ w)
        return jnp.concatenate([jnp.cos(proj), jnp.sin(proj)], axis=-1)

    h_node = mlp_ln(x, p["node_w1"], p["node_b1"], p["node_w2"], p["node_b2"],
                    p["node_g"], p["node_bt"])
    h_edge = mlp_ln(edge_attr, p["edge_w1"], p["edge_b1"], p["edge_w2"],
                    p["edge_b2"], p["edge_g"], p["edge_bt"])
    h_time = mlp_ln(rff(t, p["rff_w"]), p["time_w1"], p["time_b1"],
                    p["time_w2"], p["time_b2"], p["time_g"], p["time_bt"])
    return h_node + h_time, h_edge


if __name__ == "__main__":
    # Small shapes consistent with the module's forward.
    N, E = 16, 32                       # nodes, edges
    init_node_dim, init_edge_dim = 8, 4
    node_dim, edge_dim = 32, 16

    key = jax.random.PRNGKey(0)
    kx, ke, kt, _ = jax.random.split(key, 4)
    x = jax.random.normal(kx, (N, init_node_dim), jnp.float32)
    edge_attr = jax.random.normal(ke, (E, init_edge_dim), jnp.float32)
    t = jax.random.uniform(kt, (N, 1), jnp.float32)     # per-node diffusion time

    params = make_params(jax.random.PRNGKey(42),
                         init_node_dim, init_edge_dim, node_dim, edge_dim)
    kparams = prepare_params(params)    # one-time: cast/split/reshape, reused forever

    h_node, h_edge = encoder_forward(x, edge_attr, t, kparams)
    jax.block_until_ready((h_node, h_edge))

    # Correctness check against a pure-f32 JAX reference. bf16 MXU operands
    # (with f32 accumulation) introduce ~1e-2-scale deviations after LayerNorm,
    # so the tolerance is relaxed accordingly.
    ref_node, ref_edge = reference_forward(x, edge_attr, t, params)
    assert h_node.shape == (N, node_dim) and h_edge.shape == (E, edge_dim)
    tol = 1e-4 if _MATMUL_DTYPE == jnp.float32 else 1e-1
    assert jnp.allclose(h_node, ref_node, atol=tol, rtol=tol), \
        float(jnp.max(jnp.abs(h_node - ref_node)))
    assert jnp.allclose(h_edge, ref_edge, atol=tol, rtol=tol), \
        float(jnp.max(jnp.abs(h_edge - ref_edge)))

    print("KERNEL_OK")
</pallas_src>

<mosaic_0001>
module attributes {stable_mosaic.version = 11 : i64} {
  func.func @_edge_kernel(%arg0: i32, %arg1: memref<16x4xf32, #tpu.memory_space<vmem>>, %arg2: memref<4x16xbf16, #tpu.memory_space<vmem>>, %arg3: memref<1x16xf32, #tpu.memory_space<vmem>>, %arg4: memref<16x16xbf16, #tpu.memory_space<vmem>>, %arg5: memref<1x16xf32, #tpu.memory_space<vmem>>, %arg6: memref<1x16xf32, #tpu.memory_space<vmem>>, %arg7: memref<1x16xf32, #tpu.memory_space<vmem>>, %arg8: memref<16x16xf32, #tpu.memory_space<vmem>>) attributes {dimension_semantics = [#tpu.dimension_semantics<parallel>], iteration_bounds = array<i64: 2>, scalar_prefetch = 0 : i64, scratch_operands = 0 : i64, tpu.core_type = #tpu.core_type<tc>, window_params = [{transform_indices = @transform_0, window_bounds = array<i64: 16, 4>}, {pipeline_mode = #tpu.pipeline_mode<synchronous>, transform_indices = @transform_1, window_bounds = array<i64: 4, 16>}, {pipeline_mode = #tpu.pipeline_mode<synchronous>, transform_indices = @transform_2, window_bounds = array<i64: 1, 16>}, {pipeline_mode = #tpu.pipeline_mode<synchronous>, transform_indices = @transform_3, window_bounds = array<i64: 16, 16>}, {pipeline_mode = #tpu.pipeline_mode<synchronous>, transform_indices = @transform_4, window_bounds = array<i64: 1, 16>}, {pipeline_mode = #tpu.pipeline_mode<synchronous>, transform_indices = @transform_5, window_bounds = array<i64: 1, 16>}, {pipeline_mode = #tpu.pipeline_mode<synchronous>, transform_indices = @transform_6, window_bounds = array<i64: 1, 16>}, {transform_indices = @transform_7, window_bounds = array<i64: 16, 16>}]} {
    %c0 = arith.constant 0 : index
    %c0_0 = arith.constant 0 : index
    %0 = vector.load %arg1[%c0, %c0_0] : memref<16x4xf32, #tpu.memory_space<vmem>>, vector<16x4xf32>
    %c0_1 = arith.constant 0 : index
    %c0_2 = arith.constant 0 : index
    %1 = vector.load %arg2[%c0_1, %c0_2] : memref<4x16xbf16, #tpu.memory_space<vmem>>, vector<4x16xbf16>
    %c0_3 = arith.constant 0 : index
    %c0_4 = arith.constant 0 : index
    %2 = vector.load %arg3[%c0_3, %c0_4] : memref<1x16xf32, #tpu.memory_space<vmem>>, vector<1x16xf32>
    %c0_5 = arith.constant 0 : index
    %c0_6 = arith.constant 0 : index
    %3 = vector.load %arg4[%c0_5, %c0_6] : memref<16x16xbf16, #tpu.memory_space<vmem>>, vector<16x16xbf16>
    %c0_7 = arith.constant 0 : index
    %c0_8 = arith.constant 0 : index
    %4 = vector.load %arg5[%c0_7, %c0_8] : memref<1x16xf32, #tpu.memory_space<vmem>>, vector<1x16xf32>
    %c0_9 = arith.constant 0 : index
    %c0_10 = arith.constant 0 : index
    %5 = vector.load %arg6[%c0_9, %c0_10] : memref<1x16xf32, #tpu.memory_space<vmem>>, vector<1x16xf32>
    %c0_11 = arith.constant 0 : index
    %c0_12 = arith.constant 0 : index
    %6 = vector.load %arg7[%c0_11, %c0_12] : memref<1x16xf32, #tpu.memory_space<vmem>>, vector<1x16xf32>
    %7 = arith.truncf %0 : vector<16x4xf32> to vector<16x4xbf16>
    %cst = arith.constant dense<0.000000e+00> : vector<16x16xf32>
    %8 = tpu.matmul %7, %1, %cst {dimension_numbers = #tpu.dot_dimension_numbers<[1], [0], [0], [1], [0, 0, 1, 1], [], []>} : vector<16x4xbf16>, vector<4x16xbf16>, vector<16x16xf32> -> vector<16x16xf32>
    %9 = vector.broadcast %2 : vector<1x16xf32> to vector<16x16xf32>
    %10 = arith.addf %8, %9 : vector<16x16xf32>
    %11 = arith.negf %10 : vector<16x16xf32>
    %12 = math.exp %11 : vector<16x16xf32>
    %cst_13 = arith.constant 1.000000e+00 : f32
    %13 = vector.broadcast %cst_13 : f32 to vector<16x16xf32>
    %14 = arith.addf %13, %12 : vector<16x16xf32>
    %15 = arith.divf %13, %14 : vector<16x16xf32>
    %16 = arith.mulf %10, %15 : vector<16x16xf32>
    %17 = arith.truncf %16 : vector<16x16xf32> to vector<16x16xbf16>
    %cst_14 = arith.constant dense<0.000000e+00> : vector<16x16xf32>
    %18 = tpu.matmul %17, %3, %cst_14 {dimension_numbers = #tpu.dot_dimension_numbers<[1], [0], [0], [1], [0, 0, 1, 1], [], []>} : vector<16x16xbf16>, vector<16x16xbf16>, vector<16x16xf32> -> vector<16x16xf32>
    %19 = vector.broadcast %4 : vector<1x16xf32> to vector<16x16xf32>
    %20 = arith.addf %18, %19 : vector<16x16xf32>
    %cst_15 = arith.constant dense<0.000000e+00> : vector<16xf32>
    %21 = vector.multi_reduction <add>, %20, %cst_15 [1] : vector<16x16xf32> to vector<16xf32>
    %22 = vector.shape_cast %21 : vector<16xf32> to vector<16x1xf32>
    %cst_16 = arith.constant 1.600000e+01 : f32
    %23 = vector.broadcast %cst_16 : f32 to vector<16x1xf32>
    %24 = arith.divf %22, %23 : vector<16x1xf32>
    %25 = vector.broadcast %24 : vector<16x1xf32> to vector<16x16xf32>
    %26 = arith.subf %20, %25 : vector<16x16xf32>
    %27 = arith.mulf %26, %26 : vector<16x16xf32>
    %cst_17 = arith.constant dense<0.000000e+00> : vector<16xf32>
    %28 = vector.multi_reduction <add>, %27, %cst_17 [1] : vector<16x16xf32> to vector<16xf32>
    %29 = vector.shape_cast %28 : vector<16xf32> to vector<16x1xf32>
    %cst_18 = arith.constant 1.600000e+01 : f32
    %30 = vector.broadcast %cst_18 : f32 to vector<16x1xf32>
    %31 = arith.divf %29, %30 : vector<16x1xf32>
    %cst_19 = arith.constant 9.99999974E-6 : f32
    %32 = vector.broadcast %cst_19 : f32 to vector<16x1xf32>
    %33 = arith.addf %31, %32 : vector<16x1xf32>
    %34 = math.rsqrt %33 : vector<16x1xf32>
    %35 = vector.broadcast %34 : vector<16x1xf32> to vector<16x16xf32>
    %36 = arith.mulf %26, %35 : vector<16x16xf32>
    %37 = vector.broadcast %5 : vector<1x16xf32> to vector<16x16xf32>
    %38 = arith.mulf %36, %37 : vector<16x16xf32>
    %39 = vector.broadcast %6 : vector<1x16xf32> to vector<16x16xf32>
    %40 = arith.addf %38, %39 : vector<16x16xf32>
    %c0_20 = arith.constant 0 : index
    %c0_21 = arith.constant 0 : index
    %41 = vector.load %arg8[%c0_20, %c0_21] : memref<16x16xf32, #tpu.memory_space<vmem>>, vector<16x16xf32>
    tpu.vector_store %arg8[%c0_20, %c0_21], %40 {strides = array<i32>} : memref<16x16xf32, #tpu.memory_space<vmem>>, vector<16x16xf32>,
    return
  }
  func.func @transform_0(%arg0: i32) -> (i32, i32) {
    %c0_i32 = arith.constant 0 : i32
    %c0_i32_0 = arith.constant 0 : i32
    return %arg0, %c0_i32 : i32, i32
  }
  func.func @transform_1(%arg0: i32) -> (i32, i32) {
    %c0_i32 = arith.constant 0 : i32
    %c0_i32_0 = arith.constant 0 : i32
    %c0_i32_1 = arith.constant 0 : i32
    return %c0_i32, %c0_i32_0 : i32, i32
  }
  func.func @transform_2(%arg0: i32) -> (i32, i32) {
    %c0_i32 = arith.constant 0 : i32
    %c0_i32_0 = arith.constant 0 : i32
    %c0_i32_1 = arith.constant 0 : i32
    return %c0_i32, %c0_i32_0 : i32, i32
  }
  func.func @transform_3(%arg0: i32) -> (i32, i32) {
    %c0_i32 = arith.constant 0 : i32
    %c0_i32_0 = arith.constant 0 : i32
    %c0_i32_1 = arith.constant 0 : i32
    return %c0_i32, %c0_i32_0 : i32, i32
  }
  func.func @transform_4(%arg0: i32) -> (i32, i32) {
    %c0_i32 = arith.constant 0 : i32
    %c0_i32_0 = arith.constant 0 : i32
    %c0_i32_1 = arith.constant 0 : i32
    return %c0_i32, %c0_i32_0 : i32, i32
  }
  func.func @transform_5(%arg0: i32) -> (i32, i32) {
    %c0_i32 = arith.constant 0 : i32
    %c0_i32_0 = arith.constant 0 : i32
    %c0_i32_1 = arith.constant 0 : i32
    return %c0_i32, %c0_i32_0 : i32, i32
  }
  func.func @transform_6(%arg0: i32) -> (i32, i32) {
    %c0_i32 = arith.constant 0 : i32
    %c0_i32_0 = arith.constant 0 : i32
    %c0_i32_1 = arith.constant 0 : i32
    return %c0_i32, %c0_i32_0 : i32, i32
  }
  func.func @transform_7(%arg0: i32) -> (i32, i32) {
    %c0_i32 = arith.constant 0 : i32
    %c0_i32_0 = arith.constant 0 : i32
    return %arg0, %c0_i32 : i32, i32
  }
}

module attributes {stable_mosaic.version = 11 : i64} {
  func.func @_node_time_kernel(%arg0: i32, %arg1: memref<8x8xf32, #tpu.memory_space<vmem>>, %arg2: memref<8x1xf32, #tpu.memory_space<vmem>>, %arg3: memref<8x32xbf16, #tpu.memory_space<vmem>>, %arg4: memref<1x32xf32, #tpu.memory_space<vmem>>, %arg5: memref<32x32xbf16, #tpu.memory_space<vmem>>, %arg6: memref<1x32xf32, #tpu.memory_space<vmem>>, %arg7: memref<1x32xf32, #tpu.memory_space<vmem>>, %arg8: memref<1x32xf32, #tpu.memory_space<vmem>>, %arg9: memref<1x16xf32, #tpu.memory_space<vmem>>, %arg10: memref<16x32xbf16, #tpu.memory_space<vmem>>, %arg11: memref<16x32xbf16, #tpu.memory_space<vmem>>, %arg12: memref<1x32xf32, #tpu.memory_space<vmem>>, %arg13: memref<32x32xbf16, #tpu.memory_space<vmem>>, %arg14: memref<1x32xf32, #tpu.memory_space<vmem>>, %arg15: memref<1x32xf32, #tpu.memory_space<vmem>>, %arg16: memref<1x32xf32, #tpu.memory_space<vmem>>, %arg17: memref<8x32xf32, #tpu.memory_space<vmem>>) attributes {dimension_semantics = [#tpu.dimension_semantics<parallel>], iteration_bounds = array<i64: 2>, scalar_prefetch = 0 : i64, scratch_operands = 0 : i64, tpu.core_type = #tpu.core_type<tc>, window_params = [{transform_indices = @transform_0, window_bounds = array<i64: 8, 8>}, {transform_indices = @transform_1, window_bounds = array<i64: 8, 1>}, {pipeline_mode = #tpu.pipeline_mode<synchronous>, transform_indices = @transform_2, window_bounds = array<i64: 8, 32>}, {pipeline_mode = #tpu.pipeline_mode<synchronous>, transform_indices = @transform_3, window_bounds = array<i64: 1, 32>}, {pipeline_mode = #tpu.pipeline_mode<synchronous>, transform_indices = @transform_4, window_bounds = array<i64: 32, 32>}, {pipeline_mode = #tpu.pipeline_mode<synchronous>, transform_indices = @transform_5, window_bounds = array<i64: 1, 32>}, {pipeline_mode = #tpu.pipeline_mode<synchronous>, transform_indices = @transform_6, window_bounds = array<i64: 1, 32>}, {pipeline_mode = #tpu.pipeline_mode<synchronous>, transform_indices = @transform_7, window_bounds = array<i64: 1, 32>}, {pipeline_mode = #tpu.pipeline_mode<synchronous>, transform_indices = @transform_8, window_bounds = array<i64: 1, 16>}, {pipeline_mode = #tpu.pipeline_mode<synchronous>, transform_indices = @transform_9, window_bounds = array<i64: 16, 32>}, {pipeline_mode = #tpu.pipeline_mode<synchronous>, transform_indices = @transform_10, window_bounds = array<i64: 16, 32>}, {pipeline_mode = #tpu.pipeline_mode<synchronous>, transform_indices = @transform_11, window_bounds = array<i64: 1, 32>}, {pipeline_mode = #tpu.pipeline_mode<synchronous>, transform_indices = @transform_12, window_bounds = array<i64: 32, 32>}, {pipeline_mode = #tpu.pipeline_mode<synchronous>, transform_indices = @transform_13, window_bounds = array<i64: 1, 32>}, {pipeline_mode = #tpu.pipeline_mode<synchronous>, transform_indices = @transform_14, window_bounds = array<i64: 1, 32>}, {pipeline_mode = #tpu.pipeline_mode<synchronous>, transform_indices = @transform_15, window_bounds = array<i64: 1, 32>}, {transform_indices = @transform_16, window_bounds = array<i64: 8, 32>}]} {
    %c0 = arith.constant 0 : index
    %c0_0 = arith.constant 0 : index
    %0 = vector.load %arg1[%c0, %c0_0] : memref<8x8xf32, #tpu.memory_space<vmem>>, vector<8x8xf32>
    %c0_1 = arith.constant 0 : index
    %c0_2 = arith.constant 0 : index
    %1 = vector.load %arg3[%c0_1, %c0_2] : memref<8x32xbf16, #tpu.memory_space<vmem>>, vector<8x32xbf16>
    %c0_3 = arith.constant 0 : index
    %c0_4 = arith.constant 0 : index
    %2 = vector.load %arg4[%c0_3, %c0_4] : memref<1x32xf32, #tpu.memory_space<vmem>>, vector<1x32xf32>
    %c0_5 = arith.constant 0 : index
    %c0_6 = arith.constant 0 : index
    %3 = vector.load %arg5[%c0_5, %c0_6] : memref<32x32xbf16, #tpu.memory_space<vmem>>, vector<32x32xbf16>
    %c0_7 = arith.constant 0 : index
    %c0_8 = arith.constant 0 : index
    %4 = vector.load %arg6[%c0_7, %c0_8] : memref<1x32xf32, #tpu.memory_space<vmem>>, vector<1x32xf32>
    %c0_9 = arith.constant 0 : index
    %c0_10 = arith.constant 0 : index
    %5 = vector.load %arg7[%c0_9, %c0_10] : memref<1x32xf32, #tpu.memory_space<vmem>>, vector<1x32xf32>
    %c0_11 = arith.constant 0 : index
    %c0_12 = arith.constant 0 : index
    %6 = vector.load %arg8[%c0_11, %c0_12] : memref<1x32xf32, #tpu.memory_space<vmem>>, vector<1x32xf32>
    %7 = arith.truncf %0 : vector<8x8xf32> to vector<8x8xbf16>
    %cst = arith.constant dense<0.000000e+00> : vector<8x32xf32>
    %8 = tpu.matmul %7, %1, %cst {dimension_numbers = #tpu.dot_dimension_numbers<[1], [0], [0], [1], [0, 0, 1, 1], [], []>} : vector<8x8xbf16>, vector<8x32xbf16>, vector<8x32xf32> -> vector<8x32xf32>
    %9 = vector.broadcast %2 : vector<1x32xf32> to vector<8x32xf32>
    %10 = arith.addf %8, %9 : vector<8x32xf32>
    %11 = arith.negf %10 : vector<8x32xf32>
    %12 = math.exp %11 : vector<8x32xf32>
    %cst_13 = arith.constant 1.000000e+00 : f32
    %13 = vector.broadcast %cst_13 : f32 to vector<8x32xf32>
    %14 = arith.addf %13, %12 : vector<8x32xf32>
    %15 = arith.divf %13, %14 : vector<8x32xf32>
    %16 = arith.mulf %10, %15 : vector<8x32xf32>
    %17 = arith.truncf %16 : vector<8x32xf32> to vector<8x32xbf16>
    %cst_14 = arith.constant dense<0.000000e+00> : vector<8x32xf32>
    %18 = tpu.matmul %17, %3, %cst_14 {dimension_numbers = #tpu.dot_dimension_numbers<[1], [0], [0], [1], [0, 0, 1, 1], [], []>} : vector<8x32xbf16>, vector<32x32xbf16>, vector<8x32xf32> -> vector<8x32xf32>
    %19 = vector.broadcast %4 : vector<1x32xf32> to vector<8x32xf32>
    %20 = arith.addf %18, %19 : vector<8x32xf32>
    %cst_15 = arith.constant dense<0.000000e+00> : vector<8xf32>
    %21 = vector.multi_reduction <add>, %20, %cst_15 [1] : vector<8x32xf32> to vector<8xf32>
    %22 = vector.shape_cast %21 : vector<8xf32> to vector<8x1xf32>
    %cst_16 = arith.constant 3.200000e+01 : f32
    %23 = vector.broadcast %cst_16 : f32 to vector<8x1xf32>
    %24 = arith.divf %22, %23 : vector<8x1xf32>
    %25 = vector.broadcast %24 : vector<8x1xf32> to vector<8x32xf32>
    %26 = arith.subf %20, %25 : vector<8x32xf32>
    %27 = arith.mulf %26, %26 : vector<8x32xf32>
    %cst_17 = arith.constant dense<0.000000e+00> : vector<8xf32>
    %28 = vector.multi_reduction <add>, %27, %cst_17 [1] : vector<8x32xf32> to vector<8xf32>
    %29 = vector.shape_cast %28 : vector<8xf32> to vector<8x1xf32>
    %cst_18 = arith.constant 3.200000e+01 : f32
    %30 = vector.broadcast %cst_18 : f32 to vector<8x1xf32>
    %31 = arith.divf %29, %30 : vector<8x1xf32>
    %cst_19 = arith.constant 9.99999974E-6 : f32
    %32 = vector.broadcast %cst_19 : f32 to vector<8x1xf32>
    %33 = arith.addf %31, %32 : vector<8x1xf32>
    %34 = math.rsqrt %33 : vector<8x1xf32>
    %35 = vector.broadcast %34 : vector<8x1xf32> to vector<8x32xf32>
    %36 = arith.mulf %26, %35 : vector<8x32xf32>
    %37 = vector.broadcast %5 : vector<1x32xf32> to vector<8x32xf32>
    %38 = arith.mulf %36, %37 : vector<8x32xf32>
    %39 = vector.broadcast %6 : vector<1x32xf32> to vector<8x32xf32>
    %40 = arith.addf %38, %39 : vector<8x32xf32>
    %c0_20 = arith.constant 0 : index
    %c0_21 = arith.constant 0 : index
    %41 = vector.load %arg2[%c0_20, %c0_21] : memref<8x1xf32, #tpu.memory_space<vmem>>, vector<8x1xf32>
    %c0_22 = arith.constant 0 : index
    %c0_23 = arith.constant 0 : index
    %42 = vector.load %arg9[%c0_22, %c0_23] : memref<1x16xf32, #tpu.memory_space<vmem>>, vector<1x16xf32>
    %43 = vector.broadcast %41 : vector<8x1xf32> to vector<8x16xf32>
    %44 = vector.broadcast %42 : vector<1x16xf32> to vector<8x16xf32>
    %45 = arith.mulf %43, %44 : vector<8x16xf32>
    %cst_24 = arith.constant 6.28318548 : f32
    %46 = vector.broadcast %cst_24 : f32 to vector<8x16xf32>
    %47 = arith.mulf %46, %45 : vector<8x16xf32>
    %48 = math.cos %47 : vector<8x16xf32>
    %49 = math.sin %47 : vector<8x16xf32>
    %c0_25 = arith.constant 0 : index
    %c0_26 = arith.constant 0 : index
    %50 = vector.load %arg10[%c0_25, %c0_26] : memref<16x32xbf16, #tpu.memory_space<vmem>>, vector<16x32xbf16>
    %c0_27 = arith.constant 0 : index
    %c0_28 = arith.constant 0 : index
    %51 = vector.load %arg11[%c0_27, %c0_28] : memref<16x32xbf16, #tpu.memory_space<vmem>>, vector<16x32xbf16>
    %c0_29 = arith.constant 0 : index
    %c0_30 = arith.constant 0 : index
    %52 = vector.load %arg13[%c0_29, %c0_30] : memref<32x32xbf16, #tpu.memory_space<vmem>>, vector<32x32xbf16>
    %53 = arith.truncf %48 : vector<8x16xf32> to vector<8x16xbf16>
    %cst_31 = arith.constant dense<0.000000e+00> : vector<8x32xf32>
    %54 = tpu.matmul %53, %50, %cst_31 {dimension_numbers = #tpu.dot_dimension_numbers<[1], [0], [0], [1], [0, 0, 1, 1], [], []>} : vector<8x16xbf16>, vector<16x32xbf16>, vector<8x32xf32> -> vector<8x32xf32>
    %55 = arith.truncf %49 : vector<8x16xf32> to vector<8x16xbf16>
    %cst_32 = arith.constant dense<0.000000e+00> : vector<8x32xf32>
    %56 = tpu.matmul %55, %51, %cst_32 {dimension_numbers = #tpu.dot_dimension_numbers<[1], [0], [0], [1], [0, 0, 1, 1], [], []>} : vector<8x16xbf16>, vector<16x32xbf16>, vector<8x32xf32> -> vector<8x32xf32>
    %57 = arith.addf %54, %56 : vector<8x32xf32>
    %c0_33 = arith.constant 0 : index
    %c0_34 = arith.constant 0 : index
    %58 = vector.load %arg12[%c0_33, %c0_34] : memref<1x32xf32, #tpu.memory_space<vmem>>, vector<1x32xf32>
    %59 = vector.broadcast %58 : vector<1x32xf32> to vector<8x32xf32>
    %60 = arith.addf %57, %59 : vector<8x32xf32>
    %61 = arith.negf %60 : vector<8x32xf32>
    %62 = math.exp %61 : vector<8x32xf32>
    %cst_35 = arith.constant 1.000000e+00 : f32
    %63 = vector.broadcast %cst_35 : f32 to vector<8x32xf32>
    %64 = arith.addf %63, %62 : vector<8x32xf32>
    %65 = arith.divf %63, %64 : vector<8x32xf32>
    %66 = arith.mulf %60, %65 : vector<8x32xf32>
    %67 = arith.truncf %66 : vector<8x32xf32> to vector<8x32xbf16>
    %cst_36 = arith.constant dense<0.000000e+00> : vector<8x32xf32>
    %68 = tpu.matmul %67, %52, %cst_36 {dimension_numbers = #tpu.dot_dimension_numbers<[1], [0], [0], [1], [0, 0, 1, 1], [], []>} : vector<8x32xbf16>, vector<32x32xbf16>, vector<8x32xf32> -> vector<8x32xf32>
    %c0_37 = arith.constant 0 : index
    %c0_38 = arith.constant 0 : index
    %69 = vector.load %arg14[%c0_37, %c0_38] : memref<1x32xf32, #tpu.memory_space<vmem>>, vector<1x32xf32>
    %70 = vector.broadcast %69 : vector<1x32xf32> to vector<8x32xf32>
    %71 = arith.addf %68, %70 : vector<8x32xf32>
    %c0_39 = arith.constant 0 : index
    %c0_40 = arith.constant 0 : index
    %72 = vector.load %arg15[%c0_39, %c0_40] : memref<1x32xf32, #tpu.memory_space<vmem>>, vector<1x32xf32>
    %c0_41 = arith.constant 0 : index
    %c0_42 = arith.constant 0 : index
    %73 = vector.load %arg16[%c0_41, %c0_42] : memref<1x32xf32, #tpu.memory_space<vmem>>, vector<1x32xf32>
    %cst_43 = arith.constant dense<0.000000e+00> : vector<8xf32>
    %74 = vector.multi_reduction <add>, %71, %cst_43 [1] : vector<8x32xf32> to vector<8xf32>
    %75 = vector.shape_cast %74 : vector<8xf32> to vector<8x1xf32>
    %cst_44 = arith.constant 3.200000e+01 : f32
    %76 = vector.broadcast %cst_44 : f32 to vector<8x1xf32>
    %77 = arith.divf %75, %76 : vector<8x1xf32>
    %78 = vector.broadcast %77 : vector<8x1xf32> to vector<8x32xf32>
    %79 = arith.subf %71, %78 : vector<8x32xf32>
    %80 = arith.mulf %79, %79 : vector<8x32xf32>
    %cst_45 = arith.constant dense<0.000000e+00> : vector<8xf32>
    %81 = vector.multi_reduction <add>, %80, %cst_45 [1] : vector<8x32xf32> to vector<8xf32>
    %82 = vector.shape_cast %81 : vector<8xf32> to vector<8x1xf32>
    %cst_46 = arith.constant 3.200000e+01 : f32
    %83 = vector.broadcast %cst_46 : f32 to vector<8x1xf32>
    %84 = arith.divf %82, %83 : vector<8x1xf32>
    %cst_47 = arith.constant 9.99999974E-6 : f32
    %85 = vector.broadcast %cst_47 : f32 to vector<8x1xf32>
    %86 = arith.addf %84, %85 : vector<8x1xf32>
    %87 = math.rsqrt %86 : vector<8x1xf32>
    %88 = vector.broadcast %87 : vector<8x1xf32> to vector<8x32xf32>
    %89 = arith.mulf %79, %88 : vector<8x32xf32>
    %90 = vector.broadcast %72 : vector<1x32xf32> to vector<8x32xf32>
    %91 = arith.mulf %89, %90 : vector<8x32xf32>
    %92 = vector.broadcast %73 : vector<1x32xf32> to vector<8x32xf32>
    %93 = arith.addf %91, %92 : vector<8x32xf32>
    %94 = arith.addf %40, %93 : vector<8x32xf32>
    %c0_48 = arith.constant 0 : index
    %c0_49 = arith.constant 0 : index
    %95 = vector.load %arg17[%c0_48, %c0_49] : memref<8x32xf32, #tpu.memory_space<vmem>>, vector<8x32xf32>
    tpu.vector_store %arg17[%c0_48, %c0_49], %94 {strides = array<i32>} : memref<8x32xf32, #tpu.memory_space<vmem>>, vector<8x32xf32>,
    return
  }
  func.func @transform_0(%arg0: i32) -> (i32, i32) {
    %c0_i32 = arith.constant 0 : i32
    %c0_i32_0 = arith.constant 0 : i32
    return %arg0, %c0_i32 : i32, i32
  }
  func.func @transform_1(%arg0: i32) -> (i32, i32) {
    %c0_i32 = arith.constant 0 : i32
    %c0_i32_0 = arith.constant 0 : i32
    return %arg0, %c0_i32 : i32, i32
  }
  func.func @transform_2(%arg0: i32) -> (i32, i32) {
    %c0_i32 = arith.constant 0 : i32
    %c0_i32_0 = arith.constant 0 : i32
    %c0_i32_1 = arith.constant 0 : i32
    return %c0_i32, %c0_i32_0 : i32, i32
  }
  func.func @transform_3(%arg0: i32) -> (i32, i32) {
    %c0_i32 = arith.constant 0 : i32
    %c0_i32_0 = arith.constant 0 : i32
    %c0_i32_1 = arith.constant 0 : i32
    return %c0_i32, %c0_i32_0 : i32, i32
  }
  func.func @transform_4(%arg0: i32) -> (i32, i32) {
    %c0_i32 = arith.constant 0 : i32
    %c0_i32_0 = arith.constant 0 : i32
    %c0_i32_1 = arith.constant 0 : i32
    return %c0_i32, %c0_i32_0 : i32, i32
  }
  func.func @transform_5(%arg0: i32) -> (i32, i32) {
    %c0_i32 = arith.constant 0 : i32
    %c0_i32_0 = arith.constant 0 : i32
    %c0_i32_1 = arith.constant 0 : i32
    return %c0_i32, %c0_i32_0 : i32, i32
  }
  func.func @transform_6(%arg0: i32) -> (i32, i32) {
    %c0_i32 = arith.constant 0 : i32
    %c0_i32_0 = arith.constant 0 : i32
    %c0_i32_1 = arith.constant 0 : i32
    return %c0_i32, %c0_i32_0 : i32, i32
  }
  func.func @transform_7(%arg0: i32) -> (i32, i32) {
    %c0_i32 = arith.constant 0 : i32
    %c0_i32_0 = arith.constant 0 : i32
    %c0_i32_1 = arith.constant 0 : i32
    return %c0_i32, %c0_i32_0 : i32, i32
  }
  func.func @transform_8(%arg0: i32) -> (i32, i32) {
    %c0_i32 = arith.constant 0 : i32
    %c0_i32_0 = arith.constant 0 : i32
    %c0_i32_1 = arith.constant 0 : i32
    return %c0_i32, %c0_i32_0 : i32, i32
  }
  func.func @transform_9(%arg0: i32) -> (i32, i32) {
    %c0_i32 = arith.constant 0 : i32
    %c0_i32_0 = arith.constant 0 : i32
    %c0_i32_1 = arith.constant 0 : i32
    return %c0_i32, %c0_i32_0 : i32, i32
  }
  func.func @transform_10(%arg0: i32) -> (i32, i32) {
    %c0_i32 = arith.constant 0 : i32
    %c0_i32_0 = arith.constant 0 : i32
    %c0_i32_1 = arith.constant 0 : i32
    return %c0_i32, %c0_i32_0 : i32, i32
  }
  func.func @transform_11(%arg0: i32) -> (i32, i32) {
    %c0_i32 = arith.constant 0 : i32
    %c0_i32_0 = arith.constant 0 : i32
    %c0_i32_1 = arith.constant 0 : i32
    return %c0_i32, %c0_i32_0 : i32, i32
  }
  func.func @transform_12(%arg0: i32) -> (i32, i32) {
    %c0_i32 = arith.constant 0 : i32
    %c0_i32_0 = arith.constant 0 : i32
    %c0_i32_1 = arith.constant 0 : i32
    return %c0_i32, %c0_i32_0 : i32, i32
  }
  func.func @transform_13(%arg0: i32) -> (i32, i32) {
    %c0_i32 = arith.constant 0 : i32
    %c0_i32_0 = arith.constant 0 : i32
    %c0_i32_1 = arith.constant 0 : i32
    return %c0_i32, %c0_i32_0 : i32, i32
  }
  func.func @transform_14(%arg0: i32) -> (i32, i32) {
    %c0_i32 = arith.constant 0 : i32
    %c0_i32_0 = arith.constant 0 : i32
    %c0_i32_1 = arith.constant 0 : i32
    return %c0_i32, %c0_i32_0 : i32, i32
  }
  func.func @transform_15(%arg0: i32) -> (i32, i32) {
    %c0_i32 = arith.constant 0 : i32
    %c0_i32_0 = arith.constant 0 : i32
    %c0_i32_1 = arith.constant 0 : i32
    return %c0_i32, %c0_i32_0 : i32, i32
  }
  func.func @transform_16(%arg0: i32) -> (i32, i32) {
    %c0_i32 = arith.constant 0 : i32
    %c0_i32_0 = arith.constant 0 : i32
    return %arg0, %c0_i32 : i32, i32
  }
}

</mosaic_0001>

<bundles_post_ra>
// kernel: encoder_forward.3
= control target key start
LH: loop header
LB: loop body
LE: loop exit
PB: predicated region body
PF: predicated region fallthrough
CT: control target
= control target key end

     0   :  { %s630_s24 = smov 0   ;;  %s679_s0 = inlined_call_operand.vmem [shape: f32[32,4], index: 0, kind: input, shape index: {}]   ;;  %s680_s1 = inlined_call_operand.vmem [shape: bf16[4,16], index: 1, kind: input, shape index: {}]   ;;  %s681_s2 = inlined_call_operand.vmem [shape: f32[1,16], index: 2, kind: input, shape index: {}]   ;;  %s682_s3 = inlined_call_operand.vmem [shape: bf16[16,16], index: 3, kind: input, shape index: {}]   ;;  %s683_s4 = inlined_call_operand.vmem [shape: f32[1,16], index: 4, kind: input, shape index: {}]   ;;  %s684_s5 = inlined_call_operand.vmem [shape: f32[1,16], index: 5, kind: input, shape index: {}]   ;;  %s685_s6 = inlined_call_operand.vmem [shape: f32[1,16], index: 6, kind: input, shape index: {}]   ;;  %s686_s7 = inlined_call_operand.vmem [shape: f32[32,16], index: 7, kind: output, shape index: {}]  }
   0x1 LB: > { %s521_s25 = sadd.s32 4294967295, %s586_s24   ;;  %p525_p0 = scmp.ge.s32.totalorder %s586_s24, 1  ;;  %s586_s24 = sphi %s630_s24, %s17_s24  }
   0x2   : > { %p238_p1 = scmp.lt.s32.totalorder %s586_s24, 3 }
   0x4   : > { %p239_p2 = pnand %p525_p0, %p238_p1 }
   0x5   : > { %v285_v0 = vld [vmem:[%s680_s1] sm:$0x3] (!%p239_p2)  ;;  %vm303_vm0 = vcmask (!%p239_p2), 1041408   ;;  %s526_s28 = sshll.u32 (!%p239_p2), %s521_s25, 1  ;;  %v588_v1 = vmov (!%p239_p2), 0.0   ;;  %vm589_vm1 = vmmov (!%p239_p2), 0  }
   0x6   : > { %242 = sbr.rel (%p239_p2) target bundleno = 797 (0x31d), region = 48  ;;  %545 = vmatprep.subr.bf16.mxu0 (!%p239_p2), %v588_v1  ;;  %v305_v2 = vsel (!%p239_p2), %vm303_vm0, %v285_v0, 0  ;;  %547 = vmatprep.mubr.msk.bf16.mxu0 (!%p239_p2), %vm589_vm1, %v588_v1  ;;  %p271_p3 = scmp.lt.s32.totalorder (!%p239_p2), %s526_s28, 3  ;;  %vm299_vm2 = vcmask (!%p239_p2), 31744   ;;  %v567_v6 = vld [vmem:[%s682_s3] sm:$0xff] (!%p239_p2)   ;;  %vm375_vm3 = vcmask (!%p239_p2), 130048  }
   0x7   : > { %546 = vmatpush3.bf16.msra.mxu0 (!%p239_p2), %v305_v2  ;;  %551 = vmatprep.subr.bf16.mxu1 (!%p239_p2), %v588_v1  ;;  %v530_v7 = vld [vmem:[%s681_s2] ss:$0 sm:$0xff] (!%p239_p2) }
   0x8   : > { %553 = vmatprep.mubr.msk.bf16.mxu1 (!%p239_p2), %vm589_vm1, %v588_v1  ;;  %552 = vmatpush3.bf16.msra.mxu1 (!%p239_p2), %v567_v6  ;;  %v534_v25 = vld [vmem:[%s683_s4] ss:$0 sm:$0xff] (!%p239_p2) }
   0x9   : > { %v537_v51 = vld [vmem:[%s684_s5] ss:$0 sm:$0xff] (!%p239_p2) }
   0xa   : > { %v538_v53 = vld [vmem:[%s685_s6] ss:$0 sm:$0xff] (!%p239_p2) }
   0xd   : > { %s688_s28 = smov (!%p271_p3, %s526_s28), 3 }
   0xe   : > { %s527_s29 = sshll.u32 %s688_s28, 3 }
   0xf   : > { %s274_s9 = scalar_lea.vmem %s679_s0, %s527_s29  ;;  %s280_s22 = scalar_lea.vmem %s686_s7, %s527_s29 }
  0x10   : > { %v283_v3 = vld [vmem:[%s274_s9] sm:$0xff]  ;;  %v284_v4 = vld [vmem:[%s274_s9 + $0x8] sm:$0xff] }
  0x11   : > { %v292_v5 = vpack.c.bf16 %v284_v4, %v283_v3 }
  0x13   : > { %548 = vmatmul.mubr.msk.bf16.vlgmr.msra.gmra.mrb[0].mxu0 %vm299_vm2, %v292_v5 }
  0xe6   : > { %v341_v8 = vpop.f32.mrb[0].mxu0 }
  0xe7   : > { %v342_v9 = vadd.f32 %v530_v7, %v341_v8  ;;  %v549_v10 = vpop.f32.mrb[1].mxu0 }
  0xe8   : > { %v344_v11 = vpop.f32.mrb[2].mxu0 }
  0xe9   : > { %v532_v12 = vmul.f32 -1.442695, %v342_v9  ;;  %v345_v13 = vadd.f32 %v530_v7, %v344_v11  ;;  %v550_v14 = vpop.f32.mrb[3].mxu0 }
  0xeb   : > { %568 = vpow2.f32 %v532_v12  ;;  %v533_v15 = vmul.f32 -1.442695, %v345_v13 }
  0xed   : > { %570 = vpow2.f32 %v533_v15 }
  0xf5   : > { %v569_v16 = vpop.eup %568 }
  0xf6   : > { %v354_v17 = vadd.f32 1.0, %v569_v16 }
  0xf7   : > { %v571_v18 = vpop.eup %570 }
  0xf8   : > { %572 = vrcp.f32 %v354_v17  ;;  %v355_v19 = vadd.f32 1.0, %v571_v18 }
  0xfa   : > { %574 = vrcp.f32 %v355_v19 }
 0x102   : > { %v573_v20 = vpop.eup %572 }
 0x103   : > { %v360_v22 = vmul.f32 %v573_v20, %v342_v9 }
 0x104   : > { %v575_v21 = vpop.eup %574 }
 0x105   : > { %v361_v23 = vmul.f32 %v575_v21, %v345_v13 }
 0x107   : > { %v362_v24 = vpack.c.bf16 %v361_v23, %v360_v22 }
 0x109   : > { %554 = vmatmul.mubr.msk.bf16.vlgmr.msra.gmra.mrb[0].mxu1 %vm375_vm3, %v362_v24 }
 0x1dc   : > { %v413_v26 = vpop.f32.mrb[0].mxu1 }
 0x1dd   : > { %v414_v27 = vadd.f32 %v534_v25, %v413_v26  ;;  %v555_v28 = vpop.f32.mrb[1].mxu1 }
 0x1de   : > { %v416_v29 = vpop.f32.mrb[2].mxu1 }
 0x1df   : > { %v417_v30 = vadd.f32 %v534_v25, %v416_v29  ;;  %v556_v31 = vpop.f32.mrb[3].mxu1  ;;  %v420_v32 = vsel %vm375_vm3, %v414_v27, 0.0 }
 0x1e0   : > { %421 = vadd.xlane.f32.xlu0 %v420_v32 }
 0x1e1   : > { %v423_v33 = vsel %vm375_vm3, %v417_v30, 0.0 }
 0x1e4   : > { %424 = vadd.xlane.f32.xlu0 %v423_v33 }
 0x26d   : > { %v422_v34 = vpop.xlane.xlu0 %421 }
 0x26e   : > { %v427_v35 = vmul.f32 0.0625, %v422_v34 }
 0x270   : > { %v429_v36 = vsub.f32 %v414_v27, %v427_v35 }
 0x271   : > { %v425_v37 = vpop.xlane.xlu0 %424 }
 0x272   : > { %v428_v38 = vmul.f32 0.0625, %v425_v37  ;;  %v431_v39 = vmul.f32 %v429_v36, %v429_v36 }
 0x274   : > { %v430_v40 = vsub.f32 %v417_v30, %v428_v38  ;;  %v433_v41 = vsel %vm375_vm3, %v431_v39, 0.0 }
 0x275   : > { %434 = vadd.xlane.f32.xlu1 %v433_v41 }
 0x276   : > { %v432_v42 = vmul.f32 %v430_v40, %v430_v40 }
 0x278   : > { %v436_v43 = vsel %vm375_vm3, %v432_v42, 0.0 }
 0x279   : > { %437 = vadd.xlane.f32.xlu1 %v436_v43 }
 0x302   : > { %v435_v44 = vpop.xlane.xlu1 %434 }
 0x303   : > { %v439_v45 = vmul.f32 0.0625, %v435_v44 }
 0x305   : > { %v441_v46 = vadd.f32 1e-05, %v439_v45 }
 0x306   : > { %v438_v47 = vpop.xlane.xlu1 %437 }
 0x307   : > { %576 = vrsqrt.f32 %v441_v46  ;;  %v440_v48 = vmul.f32 0.0625, %v438_v47 }
 0x309   : > { %v442_v49 = vadd.f32 1e-05, %v440_v48 }
 0x30b   : > { %578 = vrsqrt.f32 %v442_v49 }
 0x311   : > { %v577_v50 = vpop.eup %576 }
 0x312   : > { %v445_v52 = vmul.f32 %v577_v50, %v429_v36 }
 0x314   : > { %v453_v54 = vmul.f32 %v537_v51, %v445_v52 }
 0x315   : > { %v579_v55 = vpop.eup %578 }
 0x316   : > { %v461_v56 = vadd.f32 %v538_v53, %v453_v54  ;;  %v446_v57 = vmul.f32 %v579_v55, %v430_v40 }
 0x318   : > { %463 = vst.msk [vmem:[%s280_s22] sm:$0xff] %vm375_vm3, %v461_v56  ;;  %v454_v58 = vmul.f32 %v537_v51, %v446_v57 }
 0x31a   : > { %v462_v59 = vadd.f32 %v538_v53, %v454_v58 }
 0x31c   : > { %464 = vst.msk [vmem:[%s280_s22 + $0x8] sm:$0xff] %vm375_vm3, %v462_v59 }
 0x31d PF: > { %s17_s24 = sadd.s32 1, %s586_s24  }
 0x31e   : > { %p14_p4 = scmp.ge.s32.totalorder %s17_s24, 4  }
 0x320   :  { %16 = sbr.rel (!%p14_p4) target bundleno = 1 (0x1), region = 78 }

// kernel: encoder_forward.2
= control target key start
LH: loop header
LB: loop body
LE: loop exit
PB: predicated region body
PF: predicated region fallthrough
CT: control target
= control target key end

     0   :  { %s1746_s0 = inlined_call_operand.vmem [shape: f32[16,8], index: 0, kind: input, shape index: {}]   ;;  %s1747_s1 = inlined_call_operand.vmem [shape: f32[16,1], index: 1, kind: input, shape index: {}]   ;;  %s1748_s2 = inlined_call_operand.vmem [shape: bf16[8,32], index: 2, kind: input, shape index: {}]   ;;  %s1749_s3 = inlined_call_operand.vmem [shape: f32[1,32], index: 3, kind: input, shape index: {}]   ;;  %s1750_s4 = inlined_call_operand.vmem [shape: bf16[32,32], index: 4, kind: input, shape index: {}]   ;;  %s1751_s5 = inlined_call_operand.vmem [shape: f32[1,32], index: 5, kind: input, shape index: {}]   ;;  %s1752_s6 = inlined_call_operand.vmem [shape: f32[1,32], index: 6, kind: input, shape index: {}]   ;;  %s1753_s7 = inlined_call_operand.vmem [shape: f32[1,32], index: 7, kind: input, shape index: {}]   ;;  %s1754_s8 = inlined_call_operand.vmem [shape: f32[1,16], index: 8, kind: input, shape index: {}]   ;;  %s1755_s9 = inlined_call_operand.vmem [shape: bf16[16,32], index: 9, kind: input, shape index: {}]   ;;  %s1756_s10 = inlined_call_operand.vmem [shape: bf16[16,32], index: 10, kind: input, shape index: {}]   ;;  %s1757_s11 = inlined_call_operand.vmem [shape: f32[1,32], index: 11, kind: input, shape index: {}]   ;;  %s1758_s12 = inlined_call_operand.vmem [shape: bf16[32,32], index: 12, kind: input, shape index: {}]   ;;  %s1759_s13 = inlined_call_operand.vmem [shape: f32[1,32], index: 13, kind: input, shape index: {}]   ;;  %s1760_s14 = inlined_call_operand.vmem [shape: f32[1,32], index: 14, kind: input, shape index: {}]   ;;  %s1761_s15 = inlined_call_operand.vmem [shape: f32[1,32], index: 15, kind: input, shape index: {}]   ;;  %s1762_s16 = inlined_call_operand.hbm [shape: f32[16,32], index: 16, kind: output, shape index: {}]  }
   0x1   :  { %1766 = sst [smem:[#allocation8_spill]] %s1746_s0 }
   0x2   :  { %1767 = sst [smem:[#allocation9_spill]] %s1747_s1 }
   0x3   :  { %1768 = sst [smem:[#allocation10_spill]] %s1748_s2 }
   0x4   :  { %1769 = sst [smem:[#allocation11_spill]] %s1749_s3 }
   0x5   :  { %21 = vsyncpa [#allocation3], 0 }
   0x6   :  { %23 = vsyncpa [#allocation3 + $0x1], 0  ;;  %s1544_s21 = smov 0   ;;  %s1546_s22 = smov 0  }
   0x7   :  { %s1548_s23 = smov 0   ;;  %s1550_s24 = smov 0  }
   0x8 LB: > { %1770 = sst [smem:[#allocation5_spill]] %s1443_s23  ;;  %s1565_s25 = sadd.s32 4294967295, %s1447_s24   ;;  %s1447_s24 = sphi %s1550_s24, %s1779_s24   ;;  %s1443_s23 = sphi %s1548_s23, %s1781_s23   ;;  %s1439_s22 = sphi %s1546_s22, %s1783_s22   ;;  %s1435_s21 = sphi %s1544_s21, %s1782_s21  }
   0x9   : > { %s1223_s26 = sadd.s32 4294967294, %s1447_s24   ;;  %s1569_s27 = sadd.s32 1, %s1447_s24  }
   0xa   : > { %1771 = sst [smem:[#allocation6_spill]] %s1569_s27  ;;  %s382_s28 = sadd.s32 1, %s1443_s23 }
   0xb   : > { %s379_s29 = ssub.s32 %s1447_s24, %s1569_s27  ;;  %p392_p0 = scmp.ne.s32.totalorder %s1443_s23, %s1439_s22 }
   0xc   : > { %p380_p1 = scmp.eq.s32.totalorder %s379_s29, 0  ;;  %p393_p2 = scmp.eq.s32.totalorder %s1565_s25, 1 }
   0xd   : > { %p398_p3 = scmp.ne.s32.totalorder %s1439_s22, %s1435_s21  ;;  %p399_p4 = scmp.eq.s32.totalorder %s1223_s26, 1 }
   0xe   : > { %s1580_s30 = scalar_select %p380_p1, %s1443_s23, %s382_s28  }
   0xf   : > { %p1582_p5 = por %p393_p2, %p392_p0  ;;  %p1586_p6 = por %p399_p4, %p398_p3 }
  0x10   : > { %1772 = sst [smem:[#allocation7_spill]] %s1580_s30  ;;  %p1226_p7 = scmp.ge.s32.totalorder %s1447_s24, 1 }
  0x11   : > { %p473_p8 = scmp.lt.s32.totalorder %s1447_s24, 3 }
  0x13   : > { %p474_p9 = pnand %p1226_p7, %p473_p8 }
  0x14   : > { %s1775_s2 = sld [smem:[#allocation10_spill]] (!%p474_p9)  ;;  %vm556_vm0 = vcmask (!%p474_p9), 1043456   ;;  %p526_p10 = scmp.lt.s32.totalorder (!%p474_p9), %s1565_s25, 1  ;;  %v1449_v1 = vmov (!%p474_p9), 0.0   ;;  %v1450_v2 = vmov (!%p474_p9), 0   ;;  %vm1451_vm1 = vmmov (!%p474_p9), 0  }
  0x15   : > { %477 = sbr.rel (%p474_p9) target bundleno = 1077 (0x435), region = 84  ;;  %1276 = vmatprep.subr.bf16.mxu0 (!%p474_p9), %v1449_v1  ;;  %1362 = vset.pattern.permute.xlu0 (!%p474_p9), %v1450_v2  ;;  %s1776_s1 = sld [smem:[#allocation9_spill]] (!%p474_p9)  ;;  %vm552_vm2 = vcmask (!%p474_p9), 64512   ;;  %v1363_v7 = vld [vmem:[%s1756_s10] sm:$0xff] (!%p474_p9)   ;;  %v1365_v9 = vld [vmem:[%s1750_s4 + $0x8] sm:$0xff] (!%p474_p9)  }
  0x16   : > { %1278 = vmatprep.mubr.msk.bf16.mxu0 (!%p474_p9), %vm1451_vm1, %v1449_v1  ;;  %1282 = vmatprep.subr.bf16.mxu1 (!%p474_p9), %v1449_v1  ;;  %s1777_s30 = sld [smem:[#allocation8_spill]] (!%p474_p9)  ;;  %v1364_v8 = vld [vmem:[%s1750_s4] sm:$0xff] (!%p474_p9)   ;;  %v1452_v25 = vmov (!%p474_p9), 683565275   ;;  %v1453_v27 = vmov (!%p474_p9), 2475754826  }
  0x17   : > { %1286 = vmatprep.mubr.msk.bf16.mxu1 (!%p474_p9), %vm1451_vm1, %v1449_v1  ;;  %1283 = vmatpush3.bf16.msra.mxu1 (!%p474_p9), %v1364_v8  ;;  %v1239_v10 = vld [vmem:[%s1754_s8] ss:$0 sm:$0xff] (!%p474_p9)  ;;  %v1454_v29 = vmov (!%p474_p9), 2131351028   ;;  %v1455_v31 = vmov (!%p474_p9), 2102212464  }
  0x18   : > { %1284 = vmatprep.subr.bf16.mxu1 (!%p474_p9), %v1449_v1  ;;  %v1456_v33 = vmov (!%p474_p9), 920167782   ;;  %v1457_v40 = vmov (!%p474_p9), 1326507024   ;;  %s1778_s3 = sld [smem:[#allocation11_spill]] (!%p474_p9)  ;;  %s523_s28 = sand.u32 (!%p474_p9), 1, %s1439_s22  }
  0x19   : > { %s1227_s29 = sshll.u32 (!%p474_p9), %s523_s28, 3 }
  0x1a   : > { %v536_v0 = vld [vmem:[%s1775_s2] sm:$0xf] (!%p474_p9)  ;;  %s525_s2 = scalar_lea.vmem (!%p474_p9), [#allocation2], %s1227_s29 }
  0x1b   : > { %v558_v3 = vsel (!%p474_p9), %vm556_vm0, %v536_v0, 0  ;;  %1285 = vmatpush3.bf16.msra.mxu1 (!%p474_p9), %v1365_v9  ;;  %vm936_vm0 = vcmask (!%p474_p9), 130048  }
  0x1c   : > { %1277 = vmatpush3.bf16.msra.mxu0 %v558_v3  ;;  %s527_s20 = scalar_select %p526_p10, %s1565_s25, 1  ;;  %1296 = vmatprep.subr.bf16.mxu1 %v1449_v1 }
  0x1d   : > { %1290 = vmatprep.subr.bf16.mxu0 %v1449_v1 }
  0x1e   : > { %s1228_s26 = sshll.u32 %s527_s20, 3 }
  0x1f   : > { %s533_s18 = scalar_lea.vmem %s1776_s1, %s1228_s26  ;;  %s529_s23 = scalar_lea.vmem %s1777_s30, %s1228_s26 }
  0x20   : > { %v698_v4 = vld [vmem:[%s533_s18] sm:$0xff]  ;;  %s1261_s1 = sshll.u32 %s1565_s25, 7  ;;  %s1139_s26 = scalar_lea.sflag [#allocation3], %s523_s28 }
  0x21   : > { %v535_v5 = vld [vmem:[%s529_s23] sm:$0xff]  ;;  %702 = vperm.xlu0 %1362, %v698_v4   ;;  %s1152_s23 = sshll.u32 %s525_s2, 4  ;;  %s1458_s25 = smov [#allocation2]   ;;  %s1705_s23 = int_to_ptr.vmem [resolvable:$true] %s1152_s23 }
  0x22   : > { %v545_v6 = vpack.c.bf16 %v535_v5, %v535_v5  ;;  %s1385_s18 = scalar_lea.vmem %s1705_s23, 128  ;;  %s1389_s29 = sshll.u32 %s1458_s25, 4  ;;  %s1390_s29 = int_to_ptr.vmem [resolvable:$false] %s1389_s29 }
  0x23   : > { %p1386_p11 = scmp.ne.s32.totalorder %s1705_s23, %s1385_s18  ;;  %s1391_s19 = scalar_lea.vmem %s1390_s29, 256 }
  0x24   : > { %1279 = vmatmul.mubr.msk.bf16.vlgmr.msra.gmra.mrb[0].mxu0 %vm552_vm2, %v545_v6  ;;  %p1392_p0 = scmp.lt.s32.totalorder %s1705_s23, %s1390_s29  ;;  %p1393_p1 = scmp.lt.s32.totalorder %s1391_s19, %s1385_s18 }
  0x25   : > { %1292 = vmatprep.mubr.msk.bf16.mxu0 %vm1451_vm1, %v1449_v1  ;;  %1291 = vmatpush3.bf16.msra.mxu0 %v1363_v7  ;;  %p1387_p12 = pnand %p1386_p11, %p1582_p5 }
  0x26   : > { %1302 = vmatprep.subr.bf16.mxu0 %v1449_v1  ;;  %p1394_p2 = por %p1393_p1, %p1392_p0 }
  0x27   : > { %p1388_p13 = pneg %p1387_p12 }
  0x29   : > { %p1395_p3 = pnand %p1394_p2, %p1388_p13 }
  0xa0   : > { %v703_v11 = vpop.permute.xlu0 %702 }
  0xa1   : > { %v711_v12 = vmul.f32 %v1239_v10, %v703_v11 }
  0xa3   : > { %v1627_v13 = vmul.f32 6.2831855, %v711_v12 }
  0xa5   : > { %v716_v14 = vand.u32 2139095040, %v1627_v13  ;;  %v713_v16 = vand.u32 2147483647, %v1627_v13  ;;  %vm715_vm10 = vcmp.lt.s32.totalorder %v1627_v13, 0  ;;  %vm805_vm15 = vweird.f32 %v1627_v13 }
  0xa7   : > { %v717_v15 = vshrl.u32 %v716_v14, 23  ;;  %v720_v19 = vand.u32 8388607, %v713_v16  ;;  %vm714_vm11 = vcmp.le.f32.partialorder %v713_v16, 0.7853982 }
  0xa8   : > { %v1230_v16 = vld [vmem:[%s1778_s3] ss:$0 sm:$0xff]  ;;  %s1703_s3 = scalar_lea.hbm %s1762_s16, %s1261_s1 }
  0xa9   : > { %v1240_v17 = vadd.s32 4294967169, %v717_v15  ;;  %v721_v22 = vor.u32 8388608, %v720_v19 }
  0xab   : > { %v723_v18 = vadd.s32 1, %v1240_v17  ;;  %v761_v42 = vshll.u32 %v721_v22, 8 }
  0xad   : > { %vm724_vm3 = vcmp.gt.s32.totalorder %v723_v18, 0 }
  0xae   : > { %v725_v20 = vsel %vm724_vm3, %v723_v18, 0 }
  0xaf   : > { %v727_v21 = vand.u32 31, %v725_v20  ;;  %v726_v23 = vshrl.u32 %v725_v20, 5 }
  0xb1   : > { %v728_v24 = vsub.s32 32, %v727_v21  ;;  %v730_v26 = vshll.u32 %v1452_v25, %v727_v21  ;;  %v733_v28 = vshll.u32 %v1453_v27, %v727_v21  ;;  %v736_v30 = vshll.u32 %v1454_v29, %v727_v21 }
  0xb2   : > { %v739_v32 = vshll.u32 %v1455_v31, %v727_v21  ;;  %v742_v34 = vshll.u32 %v1456_v33, %v727_v21  ;;  %vm745_vm4 = vcmp.lt.s32.totalorder %v726_v23, 1  ;;  %vm748_vm5 = vcmp.lt.s32.totalorder %v726_v23, 4 }
  0xb3   : > { %v729_v35 = vshrl.u32 %v1452_v25, %v728_v24  ;;  %v731_v36 = vshrl.u32 %v1453_v27, %v728_v24  ;;  %v734_v37 = vshrl.u32 %v1454_v29, %v728_v24  ;;  %v737_v38 = vshrl.u32 %v1455_v31, %v728_v24 }
  0xb4   : > { %v740_v39 = vshrl.u32 %v1456_v33, %v728_v24  ;;  %v743_v41 = vshrl.u32 %v1457_v40, %v728_v24  ;;  %vm746_vm6 = vcmp.lt.s32.totalorder %v726_v23, 2  ;;  %vm747_vm7 = vcmp.lt.s32.totalorder %v726_v23, 3 }
  0xb5   : > { %v732_v43 = vor.u32 %v731_v36, %v730_v26  ;;  %v735_v44 = vor.u32 %v734_v37, %v733_v28  ;;  %v738_v45 = vor.u32 %v737_v38, %v736_v30 }
  0xb6   : > { %v741_v46 = vor.u32 %v740_v39, %v739_v32  ;;  %v744_v47 = vor.u32 %v743_v41, %v742_v34 }
  0xb7   : > { %v749_v48 = vsel %vm745_vm4, %v729_v35, %v732_v43  ;;  %v750_v49 = vsel %vm748_vm5, %v738_v45, 2102212464  ;;  %v753_v50 = vsel %vm745_vm4, %v732_v43, %v735_v44  ;;  %v757_v51 = vsel %vm745_vm4, %v735_v44, %v738_v45 }
  0xb8   : > { %v751_v52 = vsel %vm747_vm7, %v735_v44, %v750_v49  ;;  %v754_v53 = vsel %vm748_vm5, %v741_v46, 920167782  ;;  %v758_v54 = vsel %vm748_vm5, %v744_v47, 1326507024  ;;  %vm626_vm4 = vcmask 261120  }
  0xb9   : > { %v755_v55 = vsel %vm747_vm7, %v738_v45, %v754_v53  ;;  %v759_v56 = vsel %vm747_vm7, %v741_v46, %v758_v54  ;;  %v752_v57 = vsel %vm746_vm6, %v749_v48, %v751_v52 }
  0xba   : > { %v756_v58 = vsel %vm746_vm6, %v753_v50, %v755_v55  ;;  %v760_v59 = vsel %vm746_vm6, %v757_v51, %v759_v56  ;;  %v768_v0 = vmul.u32 %v761_v42, %v752_v57  ;;  %v1366_v56 = vld [vmem:[%s1755_s9] sm:$0xff]  }
  0xbb   : > { %v1633_v60 = vmul.u32.u64.low %v761_v42, %v760_v59  ;;  %v1634_v61 = vmul.u32.u64.high %v761_v42, %v760_v59, %v1633_v60  ;;  %v1636_v62 = vmul.u32.u64.low %v761_v42, %v756_v58  ;;  %v1637_v63 = vmul.u32.u64.high %v761_v42, %v756_v58, %v1636_v62 }
  0xbd   : > { %vm770_vm8 = vc.u32 %v1634_v61, %v1636_v62  ;;  %v771_v2 = vadd.s32 1, %v1637_v63  ;;  %v769_v14 = vadd.s32 %v1636_v62, %v1634_v61 }
  0xbf   : > { %v772_v3 = vsel %vm770_vm8, %v771_v2, %v1637_v63  ;;  %v1367_v63 = vld [vmem:[%s1758_s12] sm:$0xff]  }
  0xc0   : > { %v773_v4 = vadd.s32 %v772_v3, %v768_v0  ;;  %v1368_v0 = vld [vmem:[%s1758_s12 + $0x8] sm:$0xff]  }
  0xc2   : > { %v774_v5 = vadd.s32 536870912, %v773_v4 }
  0xc4   : > { %v775_v6 = vshrl.u32 %v774_v5, 30  ;;  %v1233_v5 = vld [vmem:[%s1751_s5] ss:$0 sm:$0xff] }
  0xc6   : > { %v776_v7 = vshll.u32 %v775_v6, 30  ;;  %v799_v28 = vsub.s32 4, %v775_v6 }
  0xc8   : > { %v777_v8 = vsub.s32 %v773_v4, %v776_v7  ;;  %v800_v31 = vsel %vm715_vm10, %v799_v28, %v775_v6  ;;  %v1254_v28 = vld [vmem:[%s1759_s13] ss:$0 sm:$0xff] }
  0xc9   : > { %v802_v33 = vsel %vm714_vm11, 0, %v800_v31 }
  0xca   : > { %v779_v9 = vsub.s32 0, %v777_v8  ;;  %v909_v34 = vadd.s32 3, %v802_v33  ;;  %v806_v53 = vand.u32 3, %v802_v33 }
  0xcc   : > { %v1241_v10 = vmin.u32 %v779_v9, %v777_v8  ;;  %v910_v35 = vand.u32 3, %v909_v34  ;;  %vm808_vm2 = vcmp.eq.s32.totalorder %v806_v53, 0  ;;  %vm811_vm3 = vcmp.eq.s32.totalorder %v806_v53, 2 }
  0xcd   : > { %vm807_vm5 = vcmp.lt.s32.totalorder %v806_v53, 2 }
  0xce   : > { %v781_v11 = vclz %v1241_v10  ;;  %vm915_vm12 = vcmp.eq.s32.totalorder %v910_v35, 2  ;;  %vm912_vm13 = vcmp.eq.s32.totalorder %v910_v35, 0  ;;  %vm911_vm14 = vcmp.lt.s32.totalorder %v910_v35, 2 }
  0xd0   : > { %v1242_v12 = vadd.s32 4294967294, %v781_v11 }
  0xd2   : > { %vm1243_vm9 = vcmp.lt.s32.totalorder %v1242_v12, 0 }
  0xd3   : > { %v784_v15 = vsel %vm1243_vm9, 0, %v1242_v12  ;;  %v1252_v12 = vld [vmem:[%s1757_s11] ss:$0 sm:$0xff] }
  0xd4   : > { %v785_v17 = vsub.s32 32, %v784_v15  ;;  %v786_v18 = vshll.u32 %v777_v8, %v784_v15  ;;  %v789_v19 = vsub.s32 4294967266, %v784_v15 }
  0xd6   : > { %v787_v20 = vshrl.u32 %v769_v14, %v785_v17  ;;  %v790_v21 = vadd.s32 127, %v789_v19 }
  0xd8   : > { %v788_v22 = vor.u32 %v787_v20, %v786_v18  ;;  %v791_v23 = vshll.u32 %v790_v21, 23 }
  0xda   : > { %v792_v24 = vor.u32 4788187, %v791_v23  ;;  %v795_v25 = vcvt.s32.f32 %v788_v22 }
  0xdc   : > { %v793_v26 = vand.u32 2147483647, %v792_v24 }
  0xde   : > { %v796_v27 = vmul.f32 %v795_v25, %v793_v26 }
  0xe0   : > { %v797_v29 = vxor.u32 2147483648, %v796_v27 }
  0xe2   : > { %v798_v30 = vsel %vm715_vm10, %v797_v29, %v796_v27 }
  0xe3   : > { %v801_v32 = vsel %vm714_vm11, %v1627_v13, %v798_v30 }
  0xe4   : > { %1369 = vcosq.f32 %v801_v32 }
  0xe5   : > { %1371 = vsinq.f32 %v801_v32 }
  0xee   : > { %v1370_v36 = vpop.eup %1369 }
  0xef   : > { %v1372_v37 = vpop.eup %1371  ;;  %v812_v38 = vxor.u32 2147483648, %v1370_v36 }
  0xf0   : > { %v809_v39 = vxor.u32 2147483648, %v1372_v37 }
  0xf1   : > { %v917_v40 = vsel %vm915_vm12, %v812_v38, %v1372_v37  ;;  %v813_v58 = vsel %vm811_vm3, %v812_v38, %v1372_v37 }
  0xf2   : > { %v914_v41 = vsel %vm912_vm13, %v1370_v36, %v809_v39  ;;  %v810_v57 = vsel %vm808_vm2, %v1370_v36, %v809_v39 }
  0xf3   : > { %v918_v42 = vsel %vm911_vm14, %v914_v41, %v917_v40  ;;  %v814_v60 = vsel %vm807_vm5, %v810_v57, %v813_v58 }
  0xf4   : > { %v919_v44 = vsel %vm805_vm15, nan, %v918_v42  ;;  %v815_v61 = vsel %vm805_vm15, nan, %v814_v60 }
  0xf5   : > { %v929_v47 = vpack.c.bf16 %v919_v44, %v919_v44  ;;  %v928_v62 = vpack.c.bf16 %v815_v61, %v815_v61 }
  0xf7   : > { %v594_v43 = vpop.f32.mrb[0].mxu0  ;;  %1293 = vmatmul.mubr.msk.bf16.vlgmr.msra.gmra.mrb[4].mxu0 %vm936_vm0, %v929_v47 }
  0xf8   : > { %v595_v45 = vadd.f32 %v1230_v16, %v594_v43  ;;  %v1280_v46 = vpop.f32.mrb[1].mxu0  ;;  %1306 = vmatprep.mubr.msk.bf16.mxu0 %vm1451_vm1, %v1449_v1  ;;  %1303 = vmatpush3.bf16.msra.mxu0 %v1367_v63 }
  0xf9   : > { %v597_v48 = vpop.f32.mrb[2].mxu0  ;;  %1304 = vmatprep.subr.bf16.mxu0 %v1449_v1 }
  0xfa   : > { %v1232_v49 = vmul.f32 -1.442695, %v595_v45  ;;  %v1281_v50 = vpop.f32.mrb[3].mxu0 }
  0xfb   : > { %v1237_v50 = vld [vmem:[%s1752_s6] ss:$0 sm:$0xff] }
  0xfc   : > { %1373 = vpow2.f32 %v1232_v49  ;;  %1305 = vmatpush3.bf16.msra.mxu0 %v1368_v0 }
 0x106   : > { %v1374_v51 = vpop.eup %1373 }
 0x107   : > { %v603_v52 = vadd.f32 1.0, %v1374_v51 }
 0x109   : > { %1375 = vrcp.f32 %v603_v52  ;;  %v1258_v52 = vld [vmem:[%s1760_s14] ss:$0 sm:$0xff] }
 0x113   : > { %v1376_v54 = vpop.eup %1375 }
 0x114   : > { %v606_v55 = vmul.f32 %v1376_v54, %v595_v45 }
 0x116   : > { %v607_v59 = vpack.c.bf16 %v606_v55, %v606_v55  ;;  %v1238_v55 = vld [vmem:[%s1753_s7] ss:$0 sm:$0xff] }
 0x118   : > { %1287 = vmatmul.mubr.msk.bf16.vlgmr.msra.gmra.mrb[0].mxu1 %vm626_vm4, %v607_v59 }
 0x119   : > { %1297 = vmatpush3.bf16.msra.mxu1 %v1366_v56  ;;  %1298 = vmatprep.mubr.msk.bf16.mxu1 %vm1451_vm1, %v1449_v1  ;;  %v1259_v56 = vld [vmem:[%s1761_s15] ss:$0 sm:$0xff] }
 0x120   : > { %1299 = vmatmul.mubr.msk.bf16.vlgmr.msra.gmra.mrb[4].mxu1 %vm936_vm0, %v928_v62 }
 0x1ca   : > { %v974_v2 = vpop.f32.mrb[4].mxu0 }
 0x1cb   : > { %v1294_v3 = vpop.f32.mrb[5].mxu0 }
 0x1cc   : > { %v977_v4 = vpop.f32.mrb[6].mxu0 }
 0x1cd   : > { %v1295_v13 = vpop.f32.mrb[7].mxu0 }
 0x1eb   : > { %v664_v6 = vpop.f32.mrb[0].mxu1 }
 0x1ec   : > { %v665_v7 = vadd.f32 %v1233_v5, %v664_v6  ;;  %v1288_v8 = vpop.f32.mrb[1].mxu1 }
 0x1ed   : > { %v667_v9 = vpop.f32.mrb[2].mxu1 }
 0x1ee   : > { %v1289_v10 = vpop.f32.mrb[3].mxu1  ;;  %v670_v1 = vsel %vm626_vm4, %v665_v7, 0.0 }
 0x1ef   : > { %671 = vadd.xlane.f32.xlu0 %v670_v1 }
 0x1f3   : > { %v1023_v11 = vpop.f32.mrb[4].mxu1 }
 0x1f4   : > { %v1024_v14 = vadd.f32 %v1023_v11, %v974_v2  ;;  %v1300_v15 = vpop.f32.mrb[5].mxu1 }
 0x1f5   : > { %v1026_v17 = vpop.f32.mrb[6].mxu1 }
 0x1f6   : > { %v1036_v18 = vadd.f32 %v1252_v12, %v1024_v14  ;;  %v1301_v19 = vpop.f32.mrb[7].mxu1 }
 0x1f8   : > { %v1253_v20 = vmul.f32 -1.442695, %v1036_v18 }
 0x1fa   : > { %1377 = vpow2.f32 %v1253_v20 }
 0x204   : > { %v1378_v21 = vpop.eup %1377 }
 0x205   : > { %v1040_v22 = vadd.f32 1.0, %v1378_v21 }
 0x207   : > { %1379 = vrcp.f32 %v1040_v22 }
 0x211   : > { %v1380_v23 = vpop.eup %1379 }
 0x212   : > { %v1043_v24 = vmul.f32 %v1380_v23, %v1036_v18 }
 0x214   : > { %v1044_v25 = vpack.c.bf16 %v1043_v24, %v1043_v24 }
 0x216   : > { %1307 = vmatmul.mubr.msk.bf16.vlgmr.msra.gmra.mrb[8].mxu0 %vm626_vm4, %v1044_v25 }
 0x27c   : > { %v672_v26 = vpop.xlane.xlu0 %671 }
 0x27d   : > { %v674_v27 = vmul.f32 0.03125, %v672_v26 }
 0x27f   : > { %v675_v29 = vsub.f32 %v665_v7, %v674_v27 }
 0x281   : > { %v676_v36 = vmul.f32 %v675_v29, %v675_v29 }
 0x283   : > { %v677_v37 = vsel %vm626_vm4, %v676_v36, 0.0 }
 0x2e9   : > { %v1101_v30 = vpop.f32.mrb[8].mxu0 }
 0x2ea   : > { %v1102_v31 = vadd.f32 %v1254_v28, %v1101_v30  ;;  %v1308_v32 = vpop.f32.mrb[9].mxu0 }
 0x2eb   : > { %v1104_v33 = vpop.f32.mrb[10].mxu0 }
 0x2ec   : > { %v1309_v34 = vpop.f32.mrb[11].mxu0  ;;  %v1109_v35 = vsel %vm626_vm4, %v1102_v31, 0.0 }
 0x2ed   : > { %1110 = vadd.xlane.f32.xlu1 %v1109_v35 }
 0x2f1   : > { %678 = vadd.xlane.f32.xlu1 %v677_v37 }
 0x37a   : > { %v1111_v38 = vpop.xlane.xlu1 %1110 }
 0x37b   : > { %v1112_v39 = vmul.f32 0.03125, %v1111_v38 }
 0x37d   : > { %v1113_v40 = vsub.f32 %v1102_v31, %v1112_v39 }
 0x37e   : > { %v679_v42 = vpop.xlane.xlu1 %678 }
 0x37f   : > { %v1114_v16 = vmul.f32 %v1113_v40, %v1113_v40  ;;  %v680_v43 = vmul.f32 0.03125, %v679_v42 }
 0x381   : > { %v1115_v41 = vsel %vm626_vm4, %v1114_v16, 0.0  ;;  %v681_v44 = vadd.f32 1e-05, %v680_v43 }
 0x382   : > { %1116 = vadd.xlane.f32.xlu1 %v1115_v41 }
 0x383   : > { %1381 = vrsqrt.f32 %v681_v44 }
 0x38d   : > { %v1382_v48 = vpop.eup %1381 }
 0x38e   : > { %v683_v49 = vmul.f32 %v1382_v48, %v675_v29 }
 0x390   : > { %v690_v54 = vmul.f32 %v1237_v50, %v683_v49 }
 0x392   : > { %v697_v58 = vadd.f32 %v1238_v55, %v690_v54 }
 0x40f   : > { %v1117_v45 = vpop.xlane.xlu1 %1116 }
 0x410   : > { %v1118_v46 = vmul.f32 0.03125, %v1117_v45 }
 0x412   : > { %v1119_v47 = vadd.f32 1e-05, %v1118_v46 }
 0x414   : > { %1383 = vrsqrt.f32 %v1119_v47 }
 0x41e   : > { %v1384_v51 = vpop.eup %1383 }
 0x41f   : > { %v1121_v53 = vmul.f32 %v1384_v51, %v1113_v40 }
 0x421   : > { %v1128_v57 = vmul.f32 %v1258_v52, %v1121_v53 }
 0x423   : > { %v1135_v59 = vadd.f32 %v1259_v56, %v1128_v57 }
 0x425   : > { %v1136_v60 = vadd.f32 %v1135_v59, %v697_v58 }
 0x427   : > { %1137 = vst.msk [vmem:[%s525_s2] sm:$0xff] %vm626_vm4, %v1136_v60 }
 0x428   : > { %1398 = shalt.err (!%p1395_p3)
}
 0x429   : > { %s1399_s1 = scalar_lea.hbm %s1703_s3, 128  ;;  %s1403_s2 = scalar_lea.hbm %s1762_s16, 256 }
 0x42a   : > { %p1400_p4 = scmp.ne.s32.totalorder %s1703_s3, %s1399_s1  ;;  %p1404_p9 = scmp.lt.u32.totalorder %s1703_s3, %s1762_s16 }
 0x42b   : > { %p1405_p10 = scmp.lt.u32.totalorder %s1403_s2, %s1399_s1  ;;  %p1407_p12 = scmp.lt.u32.totalorder %s1399_s1, %s1703_s3 }
 0x42c   : > { %p1401_p7 = pnand %p1400_p4, %p1582_p5 }
 0x42d   : > { %p1406_p11 = por %p1405_p10, %p1404_p9 }
 0x42e   : > { %p1402_p8 = pneg %p1401_p7 }
 0x42f   : > { %p1408_p13 = por %p1407_p12, %p1406_p11 }
 0x431   : > { %p1409_p0 = pnand %p1408_p13, %p1402_p8 }
 0x433   : > { %1412 = shalt.err (!%p1409_p0)
}
 0x434   : > { %1314 = dma.vmem_to_hbm [thread:$0]  (%p1582_p5), %s1705_s23, 128, %s1703_s3, %s1139_s26  }
 0x435 PF: > { %p1320_p1 = scmp.ge.s32.totalorder %s1447_s24, 2  ;;  %s1164_s18 = sand.u32 1, %s1435_s21  }
 0x436   : > { %s1165_s25 = scalar_lea.sflag [#allocation3], %s1164_s18 }
 0x437   : > { %p1317_p2 = pnand %p1320_p1, %p1586_p6 }
 0x439   : > { %1430 = dma.done.wait (!%p1317_p2), %s1165_s25, 128  }
 0x43a   : > { %1432 = vsyncadd (!%p1317_p2), %s1165_s25, 4294967168  ;;  %s1779_s24 = sld [smem:[#allocation6_spill]]  ;;  %s1780_s29 = sld [smem:[#allocation5_spill]] }
 0x43b   : > { %s1781_s23 = sld [smem:[#allocation7_spill]]  ;;  %s1782_s21 = smov %s1439_s22 }
 0x440   : > { %p26_p3 = scmp.ge.s32.totalorder %s1779_s24, 4   ;;  %s1783_s22 = smov %s1780_s29 }
 0x442   :  { %28 = sbr.rel (!%p26_p3) target bundleno = 8 (0x8), region = 122 }
 0x449   :  { %1170 = vsyncpa [#allocation3], 1 }
 0x44a   :  { %1172 = vsyncpa [#allocation3 + $0x1], 1 }

</bundles_post_ra>
